<compile_context>
chip_gen: v5e
topology: v5e:2x2
jax: 0.10.0
libtpu: 0.0.40
codegen_flags: <defaults>
</compile_context>

<pallas_src>
import math

import jax
import jax.numpy as jnp
import numpy as np
from jax.experimental import pallas as pl
from jax.experimental.pallas import tpu as pltpu

# ---- problem sizes (small, consistent with the module) ----
B, S = 2, 8                 # batch, sequence (leading dims of x)
E_IN = 32                   # input_embedding_size
HID = 64                    # hidden_embedding_size
E_OUT = 32                  # output_embedding_size
DROPOUT = 0.1               # eval-mode => identity

LANE = 128
SUBLANE = 8
BLOCK_M = 512               # rows per tile (safe for v5e 16MiB scoped VMEM and v7x 64MiB VMEM)


def _round_up(x, m):
    return (x + m - 1) // m * m


def _gelu_exact(x):
    # nn.GELU() default = exact (erf) GELU
    return 0.5 * x * (1.0 + jax.lax.erf(x * (1.0 / math.sqrt(2.0))))


def ffn_kernel(x_ref, w1_ref, b1_ref, w2_ref, b2_ref, o_ref):
    # x_ref:  (TM, E_IN)        streamed tile
    # w1_ref: (E_IN, HID_P)     VMEM-resident
    # b1_ref: (1, HID_P)        VMEM-resident
    # w2_ref: (HID_P, E_OUT)    VMEM-resident
    # b2_ref: (1, E_OUT)        VMEM-resident
    # o_ref:  (TM, E_OUT)       streamed tile
    x = x_ref[...]
    h = jnp.dot(x, w1_ref[...], preferred_element_type=jnp.float32) + b1_ref[...]
    h = _gelu_exact(h)
    # TODO(synk): nn.Dropout is identity in eval/inference mode; training-mode RNG masking not implemented.
    y = jnp.dot(h, w2_ref[...], preferred_element_type=jnp.float32) + b2_ref[...]
    o_ref[...] = y.astype(o_ref.dtype)


def prepare_params(params):
    """One-time layout plumbing (call once, outside the forward path):
      - transpose PyTorch (out,in) weights to (in,out) so the kernel does plain x @ W
      - reshape biases to (1, out)
      - zero-pad the hidden dim to a multiple of 128 (exact: GELU(0)=0, padded W2 rows are 0)
    """
    w1, b1, w2, b2 = params
    hid, ein = w1.shape
    eout = w2.shape[0]
    hid_p = _round_up(hid, LANE)

    w1t = jnp.zeros((ein, hid_p), w1.dtype).at[:, :hid].set(jnp.transpose(w1))
    b1r = jnp.zeros((1, hid_p), b1.dtype).at[:, :hid].set(b1.reshape(1, -1))
    w2t = jnp.zeros((hid_p, eout), w2.dtype).at[:hid, :].set(jnp.transpose(w2))
    b2r = b2.reshape(1, -1)
    return (w1t, b1r, w2t, b2r)


def feed_forward_block(x, prepared, *, block_m=BLOCK_M, use_pallas=None):
    """x: (B, S, E_IN). prepared: output of prepare_params()."""
    w1t, b1r, w2t, b2r = prepared
    Bx, Sx, Ein = x.shape
    hid_p = w1t.shape[1]
    Eout = w2t.shape[1]
    M = Bx * Sx

    if use_pallas is None:
        # At toy sizes the pallas_call launch overhead dominates; plain fused XLA wins.
        use_pallas = M >= 256

    x2 = x.reshape(M, Ein)
    if not use_pallas:
        h = _gelu_exact(x2 @ w1t + b1r)
        return (h @ w2t + b2r).reshape(Bx, Sx, Eout)

    # Pick the tile size and pad M so the grid divides evenly.
    tm = min(block_m, _round_up(M, SUBLANE))
    m_pad = _round_up(M, tm)
    if m_pad != M:
        x2 = jnp.zeros((m_pad, Ein), x2.dtype).at[:M].set(x2)

    grid = (m_pad // tm,)

    flops = 2 * m_pad * (Ein * hid_p + hid_p * Eout)
    bytes_accessed = 4 * (m_pad * Ein + m_pad * Eout
                          + Ein * hid_p + hid_p * Eout + hid_p + Eout)
    cost = pl.CostEstimate(flops=flops,
                           transcendentals=m_pad * hid_p,
                           bytes_accessed=bytes_accessed)

    out = pl.pallas_call(
        ffn_kernel,
        out_shape=jax.ShapeDtypeStruct((m_pad, Eout), x.dtype),
        grid_spec=pltpu.PrefetchScalarGridSpec(
            num_scalar_prefetch=0,
            grid=grid,
            in_specs=[
                pl.BlockSpec((tm, Ein), lambda i: (i, 0)),        # streamed x tile
                pl.BlockSpec((Ein, hid_p), lambda i: (0, 0)),     # resident W1^T
                pl.BlockSpec((1, hid_p), lambda i: (0, 0)),       # resident b1
                pl.BlockSpec((hid_p, Eout), lambda i: (0, 0)),    # resident W2^T
                pl.BlockSpec((1, Eout), lambda i: (0, 0)),        # resident b2
            ],
            out_specs=pl.BlockSpec((tm, Eout), lambda i: (i, 0)), # streamed out tile
        ),
        compiler_params=pltpu.CompilerParams(
            dimension_semantics=("parallel",),          # megacore sharding on v7x
            vmem_limit_bytes=32 * 1024 * 1024,          # safe on v5e/v6e/v7x
        ),
        cost_estimate=cost,
    )(x2, w1t, b1r, w2t, b2r)

    if m_pad != M:
        out = out[:M]
    return out.reshape(Bx, Sx, Eout)


def reference(x, params):
    w1, b1, w2, b2 = params
    h = x @ w1.T + b1
    h = jax.nn.gelu(h, approximate=False)
    return h @ w2.T + b2


def make_params(key):
    ks = jax.random.split(key, 4)
    f32 = jnp.float32
    w1 = (0.1 * jax.random.normal(ks[0], (HID, E_IN))).astype(f32)    # Linear1.weight (out,in)
    b1 = (0.1 * jax.random.normal(ks[1], (HID,))).astype(f32)         # Linear1.bias
    w2 = (0.1 * jax.random.normal(ks[2], (E_OUT, HID))).astype(f32)   # Linear2.weight (out,in)
    b2 = (0.1 * jax.random.normal(ks[3], (E_OUT,))).astype(f32)       # Linear2.bias
    return (w1, b1, w2, b2)


if __name__ == "__main__":
    key = jax.random.PRNGKey(0)
    kx, kp = jax.random.split(key)
    x = jax.random.normal(kx, (B, S, E_IN), dtype=jnp.float32)
    params = make_params(kp)
    prepared = prepare_params(params)   # one-time layout prep, outside the per-call path

    out = feed_forward_block(x, prepared, use_pallas=True)  # force the Pallas path for the test
    out = jax.block_until_ready(out)

    ref = reference(x, params)
    np.testing.assert_allclose(np.asarray(out), np.asarray(ref), atol=2e-4, rtol=2e-4)
    print("KERNEL_OK")
</pallas_src>

<mosaic_0001>
module attributes {stable_mosaic.version = 11 : i64} {
  func.func @ffn_kernel(%arg0: i32, %arg1: memref<16x32xf32, #tpu.memory_space<vmem>>, %arg2: memref<32x128xf32, #tpu.memory_space<vmem>>, %arg3: memref<1x128xf32, #tpu.memory_space<vmem>>, %arg4: memref<128x32xf32, #tpu.memory_space<vmem>>, %arg5: memref<1x32xf32, #tpu.memory_space<vmem>>, %arg6: memref<16x32xf32, #tpu.memory_space<vmem>>) attributes {dimension_semantics = [#tpu.dimension_semantics<parallel>], iteration_bounds = array<i64: 1>, scalar_prefetch = 0 : i64, scratch_operands = 0 : i64, tpu.core_type = #tpu.core_type<tc>, window_params = [{transform_indices = @transform_0, window_bounds = array<i64: 16, 32>}, {pipeline_mode = #tpu.pipeline_mode<synchronous>, transform_indices = @transform_1, window_bounds = array<i64: 32, 128>}, {pipeline_mode = #tpu.pipeline_mode<synchronous>, transform_indices = @transform_2, window_bounds = array<i64: 1, 128>}, {pipeline_mode = #tpu.pipeline_mode<synchronous>, transform_indices = @transform_3, window_bounds = array<i64: 128, 32>}, {pipeline_mode = #tpu.pipeline_mode<synchronous>, transform_indices = @transform_4, window_bounds = array<i64: 1, 32>}, {transform_indices = @transform_5, window_bounds = array<i64: 16, 32>}]} {
    %c0 = arith.constant 0 : index
    %c0_0 = arith.constant 0 : index
    %0 = vector.load %arg1[%c0, %c0_0] : memref<16x32xf32, #tpu.memory_space<vmem>>, vector<16x32xf32>
    %c0_1 = arith.constant 0 : index
    %c0_2 = arith.constant 0 : index
    %1 = vector.load %arg2[%c0_1, %c0_2] : memref<32x128xf32, #tpu.memory_space<vmem>>, vector<32x128xf32>
    %cst = arith.constant dense<0.000000e+00> : vector<16x128xf32>
    %2 = tpu.matmul %0, %1, %cst {dimension_numbers = #tpu.dot_dimension_numbers<[1], [0], [0], [1], [0, 0, 1, 1], [], []>} : vector<16x32xf32>, vector<32x128xf32>, vector<16x128xf32> -> vector<16x128xf32>
    %c0_3 = arith.constant 0 : index
    %c0_4 = arith.constant 0 : index
    %3 = vector.load %arg3[%c0_3, %c0_4] : memref<1x128xf32, #tpu.memory_space<vmem>>, vector<1x128xf32>
    %4 = vector.broadcast %3 : vector<1x128xf32> to vector<16x128xf32>
    %5 = arith.addf %2, %4 : vector<16x128xf32>
    %cst_5 = arith.constant 5.000000e-01 : f32
    %6 = vector.broadcast %cst_5 : f32 to vector<16x128xf32>
    %7 = arith.mulf %6, %5 : vector<16x128xf32>
    %cst_6 = arith.constant 0.707106769 : f32
    %8 = vector.broadcast %cst_6 : f32 to vector<16x128xf32>
    %9 = arith.mulf %5, %8 : vector<16x128xf32>
    %10 = math.erf %9 : vector<16x128xf32>
    %cst_7 = arith.constant 1.000000e+00 : f32
    %11 = vector.broadcast %cst_7 : f32 to vector<16x128xf32>
    %12 = arith.addf %11, %10 : vector<16x128xf32>
    %13 = arith.mulf %7, %12 : vector<16x128xf32>
    %c0_8 = arith.constant 0 : index
    %c0_9 = arith.constant 0 : index
    %14 = vector.load %arg4[%c0_8, %c0_9] : memref<128x32xf32, #tpu.memory_space<vmem>>, vector<128x32xf32>
    %cst_10 = arith.constant dense<0.000000e+00> : vector<16x32xf32>
    %15 = tpu.matmul %13, %14, %cst_10 {dimension_numbers = #tpu.dot_dimension_numbers<[1], [0], [0], [1], [0, 0, 1, 1], [], []>} : vector<16x128xf32>, vector<128x32xf32>, vector<16x32xf32> -> vector<16x32xf32>
    %c0_11 = arith.constant 0 : index
    %c0_12 = arith.constant 0 : index
    %16 = vector.load %arg5[%c0_11, %c0_12] : memref<1x32xf32, #tpu.memory_space<vmem>>, vector<1x32xf32>
    %17 = vector.broadcast %16 : vector<1x32xf32> to vector<16x32xf32>
    %18 = arith.addf %15, %17 : vector<16x32xf32>
    %c0_13 = arith.constant 0 : index
    %c0_14 = arith.constant 0 : index
    %19 = vector.load %arg6[%c0_13, %c0_14] : memref<16x32xf32, #tpu.memory_space<vmem>>, vector<16x32xf32>
    tpu.vector_store %arg6[%c0_13, %c0_14], %18 {strides = array<i32>} : memref<16x32xf32, #tpu.memory_space<vmem>>, vector<16x32xf32>,
    return
  }
  func.func @transform_0(%arg0: i32) -> (i32, i32) {
    %c0_i32 = arith.constant 0 : i32
    %c0_i32_0 = arith.constant 0 : i32
    return %arg0, %c0_i32 : i32, i32
  }
  func.func @transform_1(%arg0: i32) -> (i32, i32) {
    %c0_i32 = arith.constant 0 : i32
    %c0_i32_0 = arith.constant 0 : i32
    %c0_i32_1 = arith.constant 0 : i32
    return %c0_i32, %c0_i32_0 : i32, i32
  }
  func.func @transform_2(%arg0: i32) -> (i32, i32) {
    %c0_i32 = arith.constant 0 : i32
    %c0_i32_0 = arith.constant 0 : i32
    %c0_i32_1 = arith.constant 0 : i32
    return %c0_i32, %c0_i32_0 : i32, i32
  }
  func.func @transform_3(%arg0: i32) -> (i32, i32) {
    %c0_i32 = arith.constant 0 : i32
    %c0_i32_0 = arith.constant 0 : i32
    %c0_i32_1 = arith.constant 0 : i32
    return %c0_i32, %c0_i32_0 : i32, i32
  }
  func.func @transform_4(%arg0: i32) -> (i32, i32) {
    %c0_i32 = arith.constant 0 : i32
    %c0_i32_0 = arith.constant 0 : i32
    %c0_i32_1 = arith.constant 0 : i32
    return %c0_i32, %c0_i32_0 : i32, i32
  }
  func.func @transform_5(%arg0: i32) -> (i32, i32) {
    %c0_i32 = arith.constant 0 : i32
    %c0_i32_0 = arith.constant 0 : i32
    return %arg0, %c0_i32 : i32, i32
  }
}

</mosaic_0001>

<bundles_post_ra>
// kernel: tpu_custom_call.1
= control target key start
LH: loop header
LB: loop body
LE: loop exit
PB: predicated region body
PF: predicated region fallthrough
CT: control target
= control target key end

     0   :  { %s409_s0 = inlined_call_operand.vmem [shape: f32[16,32], index: 0, kind: input, shape index: {}]   ;;  %s410_s1 = inlined_call_operand.vmem [shape: f32[32,128], index: 1, kind: input, shape index: {}]   ;;  %s411_s2 = inlined_call_operand.vmem [shape: f32[1,128], index: 2, kind: input, shape index: {}]   ;;  %s412_s3 = inlined_call_operand.vmem [shape: f32[128,32], index: 3, kind: input, shape index: {}]   ;;  %s413_s4 = inlined_call_operand.vmem [shape: f32[1,32], index: 4, kind: input, shape index: {}]   ;;  %s414_s5 = inlined_call_operand.hbm [shape: f32[16,32], index: 5, kind: output, shape index: {}]  }
   0x1   :  { %v26_v0 = vld [vmem:[%s410_s1 + $0x18] sm:$0xff]  ;;  %v25_v1 = vld [vmem:[%s410_s1 + $0x10] sm:$0xff]  ;;  %v24_v2 = vld [vmem:[%s410_s1 + $0x8] sm:$0xff] }
   0x2   :  { %50 = vmatpush.msra.mxu0 %v26_v0 }
   0x4   :  { %51 = vmatpush.msra.mxu0 %v25_v1 }
   0x5   :  { %10 = vsyncpa [#allocation3], 0  ;;  %v23_v3 = vld [vmem:[%s410_s1] sm:$0xff]  ;;  %vm31_vm0 = vcmask 261120   ;;  %v22_v5 = vld [vmem:[%s409_s0 + $0x8] sm:$0xff]  ;;  %s267_s10 = smov [#allocation2]  }
   0x6   :  { %52 = vmatpush.msra.mxu0 %v24_v2  ;;  %v21_v4 = vld [vmem:[%s409_s0] sm:$0xff]  ;;  %v164_v6 = vld [vmem:[%s412_s3 + $0x78] sm:$0xff]  ;;  %v163_v7 = vld [vmem:[%s412_s3 + $0x70] sm:$0xff]  ;;  %s198_s11 = sshll.u32 %s267_s10, 4  ;;  %s200_s14 = sshll.u32 %s414_s5, 4  ;;  %s199_s11 = int_to_ptr.vmem [resolvable:$true] %s198_s11  ;;  %s201_s14 = int_to_ptr.hbm [resolvable:$true] %s200_s14 }
   0x7   :  { %169 = vmatpush.msra.mxu1 %v164_v6  ;;  %216 = vmatpush.msra.mxu2 %v164_v6  ;;  %v162_v8 = vld [vmem:[%s412_s3 + $0x68] sm:$0xff]  ;;  %v161_v9 = vld [vmem:[%s412_s3 + $0x60] sm:$0xff]  ;;  %v160_v11 = vld [vmem:[%s412_s3 + $0x58] sm:$0xff]  ;;  %s268_s15 = smov 128   ;;  %s269_s16 = smov 8  }
   0x8   :  { %53 = vmatpush.msra.mxu0 %v23_v3  ;;  %v235_v10 = vld [vmem:[%s411_s2] ss:$0 sm:$0xff]  ;;  %v159_v13 = vld [vmem:[%s412_s3 + $0x50] sm:$0xff]  ;;  %v158_v15 = vld [vmem:[%s412_s3 + $0x48] sm:$0xff] }
   0x9   :  { %212 = vmatmul.msk.f32.vlgmr.msra.gmra.mxu0 %vm31_vm0, %v21_v4  ;;  %170 = vmatpush.msra.mxu1 %v163_v7  ;;  %v157_v17 = vld [vmem:[%s412_s3 + $0x40] sm:$0xff]  ;;  %v156_v19 = vld [vmem:[%s412_s3 + $0x38] sm:$0xff]  ;;  %v155_v20 = vld [vmem:[%s412_s3 + $0x30] sm:$0xff] }
   0xa   :  { %217 = vmatpush.msra.mxu2 %v163_v7  ;;  %v154_v23 = vld [vmem:[%s412_s3 + $0x28] sm:$0xff]  ;;  %v153_v27 = vld [vmem:[%s412_s3 + $0x20] sm:$0xff]  ;;  %v152_v30 = vld [vmem:[%s412_s3 + $0x18] sm:$0xff] }
   0xb   :  { %171 = vmatpush.msra.mxu1 %v162_v8  ;;  %v151_v34 = vld [vmem:[%s412_s3 + $0x10] sm:$0xff]  ;;  %v150_v37 = vld [vmem:[%s412_s3 + $0x8] sm:$0xff]  ;;  %v149_v42 = vld [vmem:[%s412_s3] sm:$0xff] }
   0xc   :  { %218 = vmatpush.msra.mxu2 %v162_v8 }
   0xd   :  { %172 = vmatpush.msra.mxu1 %v161_v9 }
   0xe   :  { %219 = vmatpush.msra.mxu2 %v161_v9 }
   0xf   :  { %173 = vmatpush.msra.mxu1 %v160_v11 }
  0x10   :  { %220 = vmatpush.msra.mxu2 %v160_v11 }
  0x11   :  { %213 = vmatmul.msk.f32.gmra.mxu0 %vm31_vm0, %v22_v5  ;;  %174 = vmatpush.msra.mxu1 %v159_v13 }
  0x12   :  { %221 = vmatpush.msra.mxu2 %v159_v13 }
  0x13   :  { %175 = vmatpush.msra.mxu1 %v158_v15 }
  0x14   :  { %222 = vmatpush.msra.mxu2 %v158_v15 }
  0x15   :  { %176 = vmatpush.msra.mxu1 %v157_v17 }
  0x16   :  { %223 = vmatpush.msra.mxu2 %v157_v17 }
  0x17   :  { %177 = vmatpush.msra.mxu1 %v156_v19 }
  0x18   :  { %224 = vmatpush.msra.mxu2 %v156_v19 }
  0x19   :  { %178 = vmatpush.msra.mxu1 %v155_v20 }
  0x1a   :  { %225 = vmatpush.msra.mxu2 %v155_v20 }
  0x1b   :  { %179 = vmatpush.msra.mxu1 %v154_v23 }
  0x1c   :  { %226 = vmatpush.msra.mxu2 %v154_v23 }
  0x1d   :  { %180 = vmatpush.msra.mxu1 %v153_v27 }
  0x1e   :  { %227 = vmatpush.msra.mxu2 %v153_v27 }
  0x1f   :  { %181 = vmatpush.msra.mxu1 %v152_v30 }
  0x20   :  { %228 = vmatpush.msra.mxu2 %v152_v30 }
  0x21   :  { %182 = vmatpush.msra.mxu1 %v151_v34 }
  0x22   :  { %229 = vmatpush.msra.mxu2 %v151_v34 }
  0x23   :  { %183 = vmatpush.msra.mxu1 %v150_v37 }
  0x24   :  { %230 = vmatpush.msra.mxu2 %v150_v37 }
  0x25   :  { %184 = vmatpush.msra.mxu1 %v149_v42 }
  0x26   :  { %231 = vmatpush.msra.mxu2 %v149_v42 }
  0x86   :  { %v55_v12 = vpop.f32.mrf.mxu0 }
  0x87   :  { %v341_v14 = vadd.f32 %v235_v10, %v55_v12 }
  0x89   :  { %v347_v16 = vmul.f32 0.70710677, %v341_v14 }
  0x8b   :  { %v65_v18 = vmul.f32 %v347_v16, %v347_v16 }
  0x8d   :  { %v360_v21 = vmin.f32 %v65_v18, 16.0 }
  0x8e   :  { %v58_v22 = vpop.f32.mrf.mxu0 }
  0x8f   :  { %v67_v24 = vmul.f32 2.1237322e-06, %v360_v21  ;;  %v366_v25 = vadd.f32 %v235_v10, %v58_v22  ;;  %v78_v26 = vmul.f32 3.8918573e-05, %v360_v21 }
  0x91   :  { %v68_v28 = vadd.f32 0.00028619796, %v67_v24  ;;  %v373_v29 = vmul.f32 0.70710677, %v366_v25  ;;  %v79_v31 = vadd.f32 0.001143296, %v78_v26 }
  0x93   :  { %v69_v32 = vmul.f32 %v68_v28, %v360_v21  ;;  %v105_v33 = vmul.f32 %v373_v29, %v373_v29  ;;  %v80_v35 = vmul.f32 %v79_v31, %v360_v21 }
  0x95   :  { %v106_v36 = vmin.f32 %v105_v33, 16.0  ;;  %v81_v38 = vadd.f32 0.014752088, %v80_v35  ;;  %v70_v39 = vadd.f32 0.0036580483, %v69_v32  ;;  %v61_v33 = vmul.f32 0.5, %v341_v14 }
  0x96   :  { %v236_v14 = vld [vmem:[%s413_s4] ss:$0 sm:$0xff] }
  0x97   :  { %v107_v40 = vmul.f32 2.1237322e-06, %v106_v36  ;;  %v118_v41 = vmul.f32 3.8918573e-05, %v106_v36  ;;  %v82_v43 = vmul.f32 %v81_v38, %v360_v21  ;;  %v71_v47 = vmul.f32 %v70_v39, %v360_v21 }
  0x99   :  { %v108_v44 = vadd.f32 0.00028619796, %v107_v40  ;;  %v119_v45 = vadd.f32 0.001143296, %v118_v41  ;;  %v83_v46 = vadd.f32 0.112945676, %v82_v43 }
  0x9a   :  { %v72_v54 = vadd.f32 0.05243302, %v71_v47  ;;  %v62_v41 = vmul.f32 0.5, %v366_v25 }
  0x9b   :  { %v109_v48 = vmul.f32 %v108_v44, %v106_v36  ;;  %v120_v49 = vmul.f32 %v119_v45, %v106_v36  ;;  %v84_v50 = vmul.f32 %v83_v46, %v360_v21 }
  0x9c   :  { %v73_v60 = vmul.f32 %v72_v54, %v360_v21 }
  0x9d   :  { %v121_v51 = vadd.f32 0.014752088, %v120_v49  ;;  %v110_v52 = vadd.f32 0.0036580483, %v109_v48  ;;  %v85_v53 = vadd.f32 0.4994258, %v84_v50 }
  0x9e   :  { %v74_v0 = vadd.f32 0.18741608, %v73_v60 }
  0x9f   :  { %v122_v55 = vmul.f32 %v121_v51, %v106_v36  ;;  %v86_v56 = vmul.f32 %v85_v53, %v360_v21  ;;  %v111_v58 = vmul.f32 %v110_v52, %v106_v36 }
  0xa0   :  { %v75_v5 = vmul.f32 %v74_v0, %v360_v21 }
  0xa1   :  { %v123_v57 = vadd.f32 0.112945676, %v122_v55  ;;  %v87_v59 = vadd.f32 1.0, %v86_v56  ;;  %v112_v63 = vadd.f32 0.05243302, %v111_v58 }
  0xa2   :  { %v76_v10 = vadd.f32 1.1283791, %v75_v5 }
  0xa3   :  { %v124_v61 = vmul.f32 %v123_v57, %v106_v36  ;;  %237 = vrcp.f32 %v87_v59  ;;  %v113_v4 = vmul.f32 %v112_v63, %v106_v36  ;;  %v99_v9 = vand.u32 2147483648, %v87_v59 }
  0xa4   :  { %v97_v12 = vand.u32 2147483647, %v87_v59  ;;  %vm93_vm2 = vweird.f32 %v87_v59  ;;  %v77_v20 = vmul.f32 %v76_v10, %v347_v16 }
  0xa5   :  { %v125_v62 = vadd.f32 0.4994258, %v124_v61  ;;  %v114_v8 = vadd.f32 0.18741608, %v113_v4  ;;  %v100_v18 = vor.u32 1.1754944e-38, %v99_v9 }
  0xa6   :  { %vm98_vm4 = vcmp.eq.f32.partialorder %v97_v12, 8.507059e+37 }
  0xa7   :  { %v126_v1 = vmul.f32 %v125_v62, %v106_v36  ;;  %v115_v17 = vmul.f32 %v114_v8, %v106_v36 }
  0xa9   :  { %v127_v2 = vadd.f32 1.0, %v126_v1  ;;  %v238_v3 = vpop.eup %237  ;;  %v116_v27 = vadd.f32 1.1283791, %v115_v17 }
  0xaa   :  { %v89_v6 = vmul.f32 %v238_v3, %v87_v59  ;;  %vm94_vm1 = vweird.f32 %v238_v3 }
  0xab   :  { %239 = vrcp.f32 %v127_v2  ;;  %vm95_vm3 = vmor %vm93_vm2, %vm94_vm1  ;;  %v139_v26 = vand.u32 2147483648, %v127_v2  ;;  %v137_v30 = vand.u32 2147483647, %v127_v2  ;;  %vm133_vm6 = vweird.f32 %v127_v2 }
  0xac   :  { %v90_v7 = vsub.f32 1.0, %v89_v6  ;;  %v117_v16 = vmul.f32 %v116_v27, %v373_v29 }
  0xad   :  { %v140_v35 = vor.u32 1.1754944e-38, %v139_v26  ;;  %vm138_vm8 = vcmp.eq.f32.partialorder %v137_v30, 8.507059e+37 }
  0xae   :  { %v91_v11 = vmul.f32 %v238_v3, %v90_v7 }
  0xb0   :  { %v92_v15 = vadd.f32 %v238_v3, %v91_v11 }
  0xb1   :  { %v240_v13 = vpop.eup %239 }
  0xb2   :  { %v129_v19 = vmul.f32 %v240_v13, %v127_v2  ;;  %v96_v22 = vsel %vm95_vm3, %v238_v3, %v92_v15  ;;  %vm134_vm5 = vweird.f32 %v240_v13 }
  0xb3   :  { %v101_v21 = vsel %vm98_vm4, %v100_v18, %v96_v22  ;;  %vm135_vm7 = vmor %vm133_vm6, %vm134_vm5 }
  0xb4   :  { %v130_v23 = vsub.f32 1.0, %v129_v19  ;;  %v102_v24 = vmul.f32 %v101_v21, %v77_v20 }
  0xb6   :  { %v131_v28 = vmul.f32 %v240_v13, %v130_v23  ;;  %v214_v31 = vclamps-f32 %v102_v24, 1.0 }
  0xb8   :  { %v132_v32 = vadd.f32 %v240_v13, %v131_v28  ;;  %v145_v34 = vadd.f32 1.0, %v214_v31 }
  0xba   :  { %v136_v36 = vsel %vm135_vm7, %v240_v13, %v132_v32  ;;  %v147_v37 = vmul.f32 %v145_v34, %v61_v33 }
  0xbb   :  { %v141_v38 = vsel %vm138_vm8, %v140_v35, %v136_v36 }
  0xbc   :  { %v142_v39 = vmul.f32 %v141_v38, %v117_v16  ;;  %185 = vmatmul.f32.vlgmr.msra.gmra.mxu1 %v147_v37 }
  0xbe   :  { %v215_v40 = vclamps-f32 %v142_v39, 1.0 }
  0xc0   :  { %v146_v42 = vadd.f32 1.0, %v215_v40 }
  0xc2   :  { %v148_v43 = vmul.f32 %v146_v42, %v62_v41 }
  0xc4   :  { %188 = vmatmul.f32.vlgmr.msra.gmra.mxu2 %v148_v43 }
 0x139   :  { %v186_v44 = vpop.f32.mrf.mxu1 }
 0x13a   :  { %v187_v45 = vadd.f32 %v236_v14, %v186_v44 }
 0x13c   :  { %192 = vst.msk [vmem:[#allocation2] sm:$0xff] %vm31_vm0, %v187_v45 }
 0x147   :  { %v189_v29 = vpop.f32.mrf.mxu2 }
 0x148   :  { %v190_v25 = vadd.f32 %v236_v14, %v189_v29 }
 0x14a   :  { %193 = vst.msk [vmem:[#allocation2 + $0x8] sm:$0xff] %vm31_vm0, %v190_v25 }
 0x14b   :  { %206 = dma.vmem_to_hbm [thread:$0]  %s199_s11, 256, %s201_s14, [#allocation3], %s268_s15, %s268_s15, %s269_s16  }
 0x14c   :  { %265 = dma.done.wait [#allocation3], 256  }
 0x14d   :  { %266 = vsyncadd [#allocation3], 4294967040 }
 0x14e   :  { %211 = vsyncpa [#allocation3], 1 }

</bundles_post_ra>
